<compile_context>
chip_gen: v7x
topology: tpu7x:2x2x1
jax: 0.10.0
libtpu: 0.0.40
codegen_flags: <defaults>
</compile_context>

<pallas_src>
import jax
import jax.numpy as jnp
from jax.experimental import pallas as pl
from jax.experimental.pallas import tpu as pltpu

_LANE = 128


def _color_math(fused, cb, cr, out_dtype):
    # Compute in f32 so 4th powers don't overflow if this is reused with bf16.
    f = fused.astype(jnp.float32)
    b = cb.astype(jnp.float32)
    r = cr.astype(jnp.float32)
    drg = (b - r) ** 2
    drb = (f - r) ** 2
    dgb = (f - b) ** 2
    return jnp.sqrt(drg * drg + drb * drb + dgb * dgb).astype(out_dtype)


def _color_kernel(fused_ref, cb_ref, cr_ref, o_ref):
    o_ref[...] = _color_math(fused_ref[...], cb_ref[...], cr_ref[...], o_ref.dtype)


def _min_sublane_rows(dtype):
    # (8,128) min tile for 4-byte dtypes, (16,128) for bf16, (32,128) for int8/fp8.
    return {4: 8, 2: 16, 1: 32}.get(jnp.dtype(dtype).itemsize, 8)


def _largest_dividing_tile(rows, min_rows, max_tile_rows):
    # Largest multiple of min_rows that divides `rows` and is <= max_tile_rows.
    units = rows // min_rows
    cap = max(1, max_tile_rows // min_rows)
    best = 1
    for u in range(1, min(units, cap) + 1):
        if units % u == 0:
            best = u
    return best * min_rows


def color_forward(fused, cb, cr, *, max_tile_rows=2048):
    assert fused.shape == cb.shape == cr.shape
    orig_shape = fused.shape
    out_dtype = fused.dtype
    total = int(fused.size)

    min_rows = _min_sublane_rows(out_dtype)
    align = _LANE * min_rows

    f1 = fused.reshape(-1)
    cb1 = cb.reshape(-1)
    cr1 = cr.reshape(-1)

    n_bulk = (total // align) * align   # aligned bulk handled by the kernel
    tail = total - n_bulk               # < align elements, handled with jnp

    pieces = []
    if n_bulk:
        rows = n_bulk // _LANE          # multiple of min_rows by construction

        if tail == 0:
            fb, cbb, crb = f1, cb1, cr1                       # pure reshape, no copy
        else:
            fb, cbb, crb = f1[:n_bulk], cb1[:n_bulk], cr1[:n_bulk]

        tile_rows = _largest_dividing_tile(rows, min_rows, max_tile_rows)
        pad_rows = 0
        if tile_rows * 8 < min(rows, max_tile_rows):
            # `rows` has awkward prime factors, so even-dividing tiles would be
            # tiny.  Pad the row axis once (one extra copy per array) rather
            # than running every DMA at a one-vreg tile size.
            tile_rows = min(max_tile_rows, rows)
            rows_padded = pl.cdiv(rows, tile_rows) * tile_rows
            pad_rows = rows_padded - rows
            pad = pad_rows * _LANE
            fb = jnp.pad(fb, (0, pad))
            cbb = jnp.pad(cbb, (0, pad))
            crb = jnp.pad(crb, (0, pad))
            rows = rows_padded

        fb = fb.reshape(rows, _LANE)
        cbb = cbb.reshape(rows, _LANE)
        crb = crb.reshape(rows, _LANE)

        grid = (rows // tile_rows,)
        spec = pl.BlockSpec((tile_rows, _LANE), lambda i: (i, 0))

        itemsize = jnp.dtype(out_dtype).itemsize
        n_elems = rows * _LANE
        cost = pl.CostEstimate(
            flops=11 * n_elems,
            transcendentals=n_elems,
            bytes_accessed=4 * n_elems * itemsize,
        )

        # 3 inputs + 1 output, each double-buffered by the BlockSpec pipeline.
        vmem_needed = 4 * 2 * tile_rows * _LANE * itemsize
        cp_kwargs = dict(dimension_semantics=("parallel",))
        if vmem_needed > 12 * 1024 * 1024:
            # Only triggers if max_tile_rows is raised past the default; keep
            # headroom and stay under v7x's 64 MiB physical VMEM.
            cp_kwargs["vmem_limit_bytes"] = min(2 * vmem_needed, 48 * 1024 * 1024)

        bulk_out = pl.pallas_call(
            _color_kernel,
            out_shape=jax.ShapeDtypeStruct((rows, _LANE), out_dtype),
            grid_spec=pltpu.PrefetchScalarGridSpec(
                num_scalar_prefetch=0,
                grid=grid,
                in_specs=[spec, spec, spec],
                out_specs=spec,
            ),
            compiler_params=pltpu.CompilerParams(**cp_kwargs),
            cost_estimate=cost,
        )(fb, cbb, crb)

        bulk_out = bulk_out.reshape(-1)
        if pad_rows:
            bulk_out = bulk_out[:n_bulk]
        pieces.append(bulk_out)

    if tail:
        # Sub-(min_rows x 128) remainder: cheaper with plain jnp than padding
        # every input (padding would cost a full extra HBM copy per array).
        pieces.append(_color_math(f1[n_bulk:], cb1[n_bulk:], cr1[n_bulk:], out_dtype))

    out = pieces[0] if len(pieces) == 1 else jnp.concatenate(pieces)
    return out.reshape(orig_shape)


def color_reference(fused, cb, cr):
    drg = (cb - cr) ** 2
    drb = (fused - cr) ** 2
    dgb = (fused - cb) ** 2
    return jnp.sqrt(drg**2 + drb**2 + dgb**2)


if __name__ == "__main__":
    key = jax.random.PRNGKey(0)

    # Primary check: aligned NCHW shape (no padding / slicing path taken).
    k1, k2, k3, k4, k5, k6 = jax.random.split(key, 6)
    shape = (2, 4, 16, 16)  # NCHW
    fused = jax.random.uniform(k1, shape, dtype=jnp.float32)
    cb = jax.random.uniform(k2, shape, dtype=jnp.float32)
    cr = jax.random.uniform(k3, shape, dtype=jnp.float32)

    out = color_forward(fused, cb, cr)
    jax.block_until_ready(out)
    ref = color_reference(fused, cb, cr)
    assert out.shape == shape and out.dtype == jnp.float32
    assert jnp.allclose(out, ref, atol=1e-5, rtol=1e-5)

    # Secondary check: unaligned element count (exercises the jnp tail path).
    shape2 = (2, 3, 17, 19)
    fused2 = jax.random.uniform(k4, shape2, dtype=jnp.float32)
    cb2 = jax.random.uniform(k5, shape2, dtype=jnp.float32)
    cr2 = jax.random.uniform(k6, shape2, dtype=jnp.float32)

    out2 = color_forward(fused2, cb2, cr2)
    jax.block_until_ready(out2)
    ref2 = color_reference(fused2, cb2, cr2)
    assert out2.shape == shape2 and out2.dtype == jnp.float32
    assert jnp.allclose(out2, ref2, atol=1e-5, rtol=1e-5)

    print("KERNEL_OK")
</pallas_src>

<mosaic_0001>
module attributes {stable_mosaic.version = 11 : i64} {
  func.func @_color_kernel(%arg0: i32, %arg1: memref<16x128xf32, #tpu.memory_space<vmem>>, %arg2: memref<16x128xf32, #tpu.memory_space<vmem>>, %arg3: memref<16x128xf32, #tpu.memory_space<vmem>>, %arg4: memref<16x128xf32, #tpu.memory_space<vmem>>) attributes {dimension_semantics = [#tpu.dimension_semantics<parallel>], iteration_bounds = array<i64: 1>, scalar_prefetch = 0 : i64, scratch_operands = 0 : i64, tpu.core_type = #tpu.core_type<tc>, window_params = [{transform_indices = @transform_0, window_bounds = array<i64: 16, 128>}, {transform_indices = @transform_1, window_bounds = array<i64: 16, 128>}, {transform_indices = @transform_2, window_bounds = array<i64: 16, 128>}, {transform_indices = @transform_3, window_bounds = array<i64: 16, 128>}]} {
    %c0 = arith.constant 0 : index
    %c0_0 = arith.constant 0 : index
    %0 = vector.load %arg1[%c0, %c0_0] : memref<16x128xf32, #tpu.memory_space<vmem>>, vector<16x128xf32>
    %c0_1 = arith.constant 0 : index
    %c0_2 = arith.constant 0 : index
    %1 = vector.load %arg2[%c0_1, %c0_2] : memref<16x128xf32, #tpu.memory_space<vmem>>, vector<16x128xf32>
    %c0_3 = arith.constant 0 : index
    %c0_4 = arith.constant 0 : index
    %2 = vector.load %arg3[%c0_3, %c0_4] : memref<16x128xf32, #tpu.memory_space<vmem>>, vector<16x128xf32>
    %3 = arith.subf %1, %2 : vector<16x128xf32>
    %4 = arith.mulf %3, %3 : vector<16x128xf32>
    %5 = arith.subf %0, %2 : vector<16x128xf32>
    %6 = arith.mulf %5, %5 : vector<16x128xf32>
    %7 = arith.subf %0, %1 : vector<16x128xf32>
    %8 = arith.mulf %7, %7 : vector<16x128xf32>
    %9 = arith.mulf %4, %4 : vector<16x128xf32>
    %10 = arith.mulf %6, %6 : vector<16x128xf32>
    %11 = arith.addf %9, %10 : vector<16x128xf32>
    %12 = arith.mulf %8, %8 : vector<16x128xf32>
    %13 = arith.addf %11, %12 : vector<16x128xf32>
    %14 = math.sqrt %13 : vector<16x128xf32>
    %c0_5 = arith.constant 0 : index
    %c0_6 = arith.constant 0 : index
    %15 = vector.load %arg4[%c0_5, %c0_6] : memref<16x128xf32, #tpu.memory_space<vmem>>, vector<16x128xf32>
    tpu.vector_store %arg4[%c0_5, %c0_6], %14 {strides = array<i32>} : memref<16x128xf32, #tpu.memory_space<vmem>>, vector<16x128xf32>,
    return
  }
  func.func @transform_0(%arg0: i32) -> (i32, i32) {
    %c0_i32 = arith.constant 0 : i32
    %c0_i32_0 = arith.constant 0 : i32
    return %arg0, %c0_i32 : i32, i32
  }
  func.func @transform_1(%arg0: i32) -> (i32, i32) {
    %c0_i32 = arith.constant 0 : i32
    %c0_i32_0 = arith.constant 0 : i32
    return %arg0, %c0_i32 : i32, i32
  }
  func.func @transform_2(%arg0: i32) -> (i32, i32) {
    %c0_i32 = arith.constant 0 : i32
    %c0_i32_0 = arith.constant 0 : i32
    return %arg0, %c0_i32 : i32, i32
  }
  func.func @transform_3(%arg0: i32) -> (i32, i32) {
    %c0_i32 = arith.constant 0 : i32
    %c0_i32_0 = arith.constant 0 : i32
    return %arg0, %c0_i32 : i32, i32
  }
}

</mosaic_0001>

<bundles_post_ra>
// kernel: tpu_custom_call.1
= control target key start
LH: loop header
LB: loop body
LE: loop exit
PB: predicated region body
PF: predicated region fallthrough
CT: control target
= control target key end

     0   :  { %8 = vsyncpa [#allocation3], 0  ;;  %s315_s0 = inlined_call_operand.hbm [shape: f32[16,128], index: 0, kind: input, shape index: {}]   ;;  %s316_s1 = inlined_call_operand.hbm [shape: f32[16,128], index: 1, kind: input, shape index: {}]   ;;  %s317_s2 = inlined_call_operand.hbm [shape: f32[16,128], index: 2, kind: input, shape index: {}]   ;;  %s318_s3 = inlined_call_operand.hbm [shape: f32[16,128], index: 3, kind: output, shape index: {}]  }
   0x1   :  { %9 = vsyncpa [#allocation6], 0 }
   0x2   :  { %10 = vsyncpa [#allocation4], 0  ;;  %s222_s12 = smov [#allocation5]   ;;  %s223_s14 = smov [#allocation2]  }
   0x3   :  { %s28_s13 = sshll.u32 %s222_s12, 4  ;;  %s16_s15 = sshll.u32 %s223_s14, 4  ;;  %s29_s13 = int_to_ptr.vmem [resolvable:$true] %s28_s13  ;;  %s248_s15 = int_to_ptr.vmem [resolvable:$true] %s16_s15 }
   0x4   :  { %s128_s18 = scalar_lea.hbm %s316_s1, 256 }
   0x5   :  { %p129_p0 = scmp.ne.s32.totalorder %s316_s1, %s128_s18  ;;  %p132_p1 = scmp.lt.u32.totalorder %s128_s18, %s316_s1 }
   0x7   :  { %p134_p2 = pnand %p132_p1, %p129_p0 }
   0x9   :  { %137 = shalt.err (!%p134_p2)
}
   0xa   :  { %s138_s23 = scalar_lea.vmem %s29_s13, 256  ;;  %p143_p4 = scmp.lt.s32.totalorder %s29_s13, %s29_s13 }
   0xb   :  { %p139_p3 = scmp.ne.s32.totalorder %s29_s13, %s138_s23  ;;  %p144_p5 = scmp.lt.s32.totalorder %s138_s23, %s138_s23 }
   0xd   :  { %p145_p6 = por %p144_p5, %p143_p4 }
   0xf   :  { %p146_p7 = pnand %p145_p6, %p139_p3 }
  0x11   :  { %149 = shalt.err (!%p146_p7)
}
  0x12   :  { %s224_s24 = smov 128   ;;  %s225_s25 = smov 8  }
  0x13   :  { %34 = dma.hbm_to_vmem [thread:$0]  %s316_s1, 256, %s29_s13, [#allocation6], %s224_s24, %s224_s24, %s225_s25  }
  0x14   :  { %s150_s30 = scalar_lea.hbm %s315_s0, 256 }
  0x15   :  { %p151_p8 = scmp.ne.s32.totalorder %s315_s0, %s150_s30  ;;  %p154_p9 = scmp.lt.u32.totalorder %s150_s30, %s315_s0 }
  0x17   :  { %p156_p10 = pnand %p154_p9, %p151_p8 }
  0x19   :  { %159 = shalt.err (!%p156_p10)
}
  0x1a   :  { %s160_s8 = scalar_lea.vmem %s248_s15, 256  ;;  %p165_p12 = scmp.lt.s32.totalorder %s248_s15, %s248_s15 }
  0x1b   :  { %p161_p11 = scmp.ne.s32.totalorder %s248_s15, %s160_s8  ;;  %p166_p13 = scmp.lt.s32.totalorder %s160_s8, %s160_s8 }
  0x1d   :  { %p167_p0 = por %p166_p13, %p165_p12 }
  0x1f   :  { %p168_p1 = pnand %p167_p0, %p161_p11 }
  0x21   :  { %171 = shalt.err (!%p168_p1)
}
  0x22   :  { %22 = dma.hbm_to_vmem [thread:$0]  %s315_s0, 256, %s248_s15, [#allocation3], %s224_s24, %s224_s24, %s225_s25  }
  0x23   :  { %s226_s10 = smov [#allocation7]   ;;  %s172_s14 = scalar_lea.hbm %s317_s2, 256 }
  0x24   :  { %s40_s11 = sshll.u32 %s226_s10, 4  ;;  %p173_p2 = scmp.ne.s32.totalorder %s317_s2, %s172_s14  ;;  %s41_s11 = int_to_ptr.vmem [resolvable:$true] %s40_s11 }
  0x25   :  { %p176_p3 = scmp.lt.u32.totalorder %s172_s14, %s317_s2 }
  0x27   :  { %p178_p4 = pnand %p176_p3, %p173_p2 }
  0x29   :  { %181 = shalt.err (!%p178_p4)
}
  0x2a   :  { %s182_s20 = scalar_lea.vmem %s41_s11, 256  ;;  %p187_p6 = scmp.lt.s32.totalorder %s41_s11, %s41_s11 }
  0x2b   :  { %p183_p5 = scmp.ne.s32.totalorder %s41_s11, %s182_s20  ;;  %p188_p7 = scmp.lt.s32.totalorder %s182_s20, %s182_s20 }
  0x2d   :  { %p189_p8 = por %p188_p7, %p187_p6 }
  0x2f   :  { %p190_p9 = pnand %p189_p8, %p183_p5 }
  0x31   :  { %193 = shalt.err (!%p190_p9)
}
  0x32   :  { %46 = dma.hbm_to_vmem [thread:$0]  %s317_s2, 256, %s41_s11, [#allocation6], %s224_s24, %s224_s24, %s225_s25  }
  0x33   :  { %216 = dma.done.wait [#allocation3], 256  }
  0x34   :  { %217 = vsyncadd [#allocation3], 4294967040 }
  0x35   :  { %218 = dma.done.wait [#allocation6], 512  }
  0x36   :  { %219 = vsyncadd [#allocation6], 4294966784  ;;  %v56_v0 = vld [vmem:[#allocation2] sm:$0xff]  ;;  %v58_v1 = vld [vmem:[#allocation5] sm:$0xff]  ;;  %s227_s2 = smov [#allocation8]  }
  0x37   :  { %v60_v2 = vld [vmem:[#allocation7] sm:$0xff]  ;;  %v70_v5 = vsub.f32 %v56_v0, %v58_v1  ;;  %v57_v6 = vld [vmem:[#allocation2 + $0x8] sm:$0xff]  ;;  %v59_v7 = vld [vmem:[#allocation5 + $0x8] sm:$0xff]  ;;  %s105_s21 = sshll.u32 %s227_s2, 4  ;;  %s106_s21 = int_to_ptr.vmem [resolvable:$true] %s105_s21 }
  0x38   :  { %v62_v3 = vsub.f32 %v58_v1, %v60_v2  ;;  %v66_v4 = vsub.f32 %v56_v0, %v60_v2  ;;  %v61_v8 = vld [vmem:[#allocation7 + $0x8] sm:$0xff]  ;;  %v71_v11 = vsub.f32 %v57_v6, %v59_v7  ;;  %s194_s22 = scalar_lea.vmem %s106_s21, 256  ;;  %p199_p11 = scmp.lt.s32.totalorder %s106_s21, %s106_s21 }
  0x39   :  { %v63_v9 = vsub.f32 %v59_v7, %v61_v8  ;;  %v67_v10 = vsub.f32 %v57_v6, %v61_v8  ;;  %v72_v14 = vmul.f32 %v70_v5, %v70_v5  ;;  %p195_p10 = scmp.ne.s32.totalorder %s106_s21, %s194_s22  ;;  %p200_p12 = scmp.lt.s32.totalorder %s194_s22, %s194_s22 }
  0x3a   :  { %v64_v12 = vmul.f32 %v62_v3, %v62_v3  ;;  %v68_v13 = vmul.f32 %v66_v4, %v66_v4  ;;  %v73_v17 = vmul.f32 %v71_v11, %v71_v11 }
  0x3b   :  { %v65_v15 = vmul.f32 %v63_v9, %v63_v9  ;;  %v69_v16 = vmul.f32 %v67_v10, %v67_v10  ;;  %v80_v20 = vmul.f32 %v72_v14, %v72_v14  ;;  %p201_p13 = por %p200_p12, %p199_p11 }
  0x3c   :  { %v74_v18 = vmul.f32 %v64_v12, %v64_v12  ;;  %v76_v19 = vmul.f32 %v68_v13, %v68_v13  ;;  %v81_v23 = vmul.f32 %v73_v17, %v73_v17 }
  0x3d   :  { %v75_v21 = vmul.f32 %v65_v15, %v65_v15  ;;  %v77_v22 = vmul.f32 %v69_v16, %v69_v16  ;;  %p202_p0 = pnand %p201_p13, %p195_p10 }
  0x3e   :  { %v78_v24 = vadd.f32 %v76_v19, %v74_v18 }
  0x3f   :  { %v79_v25 = vadd.f32 %v77_v22, %v75_v21 }
  0x40   :  { %v82_v26 = vadd.f32 %v80_v20, %v78_v24 }
  0x41   :  { %v83_v27 = vadd.f32 %v81_v23, %v79_v25 }
  0x42   :  { %124 = vrsqrt.f32 %v82_v26  ;;  %vm86_vm0 = vcmp.eq.f32.partialorder %v82_v26, inf  ;;  %v89_v29 = vand.u32 2147483648, %v82_v26  ;;  %vm88_vm1 = vcmp.eq.f32.partialorder %v82_v26, 0.0 }
  0x43   :  { %126 = vrsqrt.f32 %v83_v27  ;;  %vm93_vm2 = vcmp.eq.f32.partialorder %v83_v27, inf  ;;  %v96_v32 = vand.u32 2147483648, %v83_v27  ;;  %vm95_vm3 = vcmp.eq.f32.partialorder %v83_v27, 0.0 }
  0x4c   :  { %v125_v28 = vpop.eup %124 }
  0x4d   :  { %v127_v30 = vpop.eup %126  ;;  %v85_v31 = vmul.f32 %v125_v28, %v82_v26 }
  0x4e   :  { %v92_v33 = vmul.f32 %v127_v30, %v83_v27 }
  0x4f   :  { %v87_v34 = vsel %vm86_vm0, %v82_v26, %v85_v31 }
  0x50   :  { %v90_v35 = vsel %vm88_vm1, %v89_v29, %v87_v34  ;;  %v94_v36 = vsel %vm93_vm2, %v83_v27, %v92_v33 }
  0x51   :  { %98 = vst [vmem:[#allocation8] sm:$0xff] %v90_v35  ;;  %v97_v37 = vsel %vm95_vm3, %v96_v32, %v94_v36 }
  0x52   :  { %99 = vst [vmem:[#allocation8 + $0x8] sm:$0xff] %v97_v37 }
  0x53   :  { %205 = shalt.err (!%p202_p0)
}
  0x54   :  { %s206_s27 = scalar_lea.hbm %s318_s3, 256 }
  0x55   :  { %p207_p1 = scmp.ne.s32.totalorder %s318_s3, %s206_s27  ;;  %p210_p2 = scmp.lt.u32.totalorder %s206_s27, %s318_s3 }
  0x57   :  { %p212_p3 = pnand %p210_p2, %p207_p1 }
  0x59   :  { %215 = shalt.err (!%p212_p3)
}
  0x5a   :  { %111 = dma.vmem_to_hbm [thread:$0]  %s106_s21, 256, %s318_s3, [#allocation4], %s224_s24, %s224_s24, %s225_s25  }
  0x5b   :  { %220 = dma.done.wait [#allocation4], 256  }
  0x5c   :  { %221 = vsyncadd [#allocation4], 4294967040 }
  0x5d   :  { %115 = vsyncpa [#allocation3], 1 }
  0x5e   :  { %116 = vsyncpa [#allocation6], 1 }
  0x5f   :  { %117 = vsyncpa [#allocation4], 1 }

</bundles_post_ra>
